<compile_context>
chip_gen: v6e
topology: v6e:2x2x1
jax: 0.10.0
libtpu: 0.0.40
codegen_flags: <defaults>
</compile_context>

<pallas_src>
import jax
import jax.numpy as jnp
from jax.experimental import pallas as pl
from jax.experimental.pallas import tpu as pltpu


def _round_up(x, m):
    return ((x + m - 1) // m) * m


# ---------------------------------------------------------------------------
# Kernel 1: row-tiled dense layer  out = x @ w + b
#   Only used for the tiny gate-table precompute  (V, E) @ (E, 4Hp).
# ---------------------------------------------------------------------------
def _dense_kernel(x_ref, w_ref, b_ref, o_ref):
    o_ref[...] = (jnp.dot(x_ref[...], w_ref[...],
                          preferred_element_type=jnp.float32)
                  + b_ref[...]).astype(o_ref.dtype)


def _dense(x, w, b, *, tm_max=512):
    """x: (M, K), w: (K, N) with N % 128 == 0, b: (N,) -> (M, N) f32."""
    M, K = x.shape
    Kw, N = w.shape
    assert K == Kw and N % 128 == 0
    M8 = _round_up(M, 8)
    tm = M8 if M8 <= tm_max else tm_max
    M_pad = _round_up(M8, tm)
    if M_pad != M:
        x = jnp.pad(x, ((0, M_pad - M), (0, 0)))
    out = pl.pallas_call(
        _dense_kernel,
        out_shape=jax.ShapeDtypeStruct((M_pad, N), jnp.float32),
        grid_spec=pltpu.PrefetchScalarGridSpec(
            num_scalar_prefetch=0,
            grid=(M_pad // tm,),
            in_specs=[
                pl.BlockSpec((tm, K), lambda i: (i, 0)),
                pl.BlockSpec((K, N), lambda i: (0, 0)),
                pl.BlockSpec((1, N), lambda i: (0, 0)),
            ],
            out_specs=pl.BlockSpec((tm, N), lambda i: (i, 0)),
        ),
        compiler_params=pltpu.CompilerParams(
            dimension_semantics=("parallel",)),
    )(x, w, b.reshape(1, N))
    return out[:M]


# ---------------------------------------------------------------------------
# Kernel 2: time-chunked LSTM recurrence with fused vocab projection.
#   Grid axis = time chunks ("arbitrary": chunks are serially dependent).
#   h/c live in VMEM scratch across chunks; initialized at chunk 0 via pl.when.
#   Per chunk:  Tc serial steps  ->  one (Tc*Bp, Hp) @ (Hp, Vp) projection matmul.
# ---------------------------------------------------------------------------
def _make_lstm_kernel(L_real, Tc, Hp, Vp, mask_tail):
    def kernel(xg_ref, whh_ref, wproj_ref, bproj_ref, h0_ref, c0_ref,
               scores_ref, hN_ref, cN_ref, h_sc, c_sc, hseq_sc):
        @pl.when(pl.program_id(0) == 0)
        def _():
            h_sc[...] = h0_ref[...]
            c_sc[...] = c0_ref[...]

        base = pl.program_id(0) * Tc
        Bp = h_sc.shape[0]

        def step(t, carry):
            h_prev = h_sc[...]
            c_prev = c_sc[...]
            gates = xg_ref[t] + jnp.dot(h_prev, whh_ref[...],
                                        preferred_element_type=jnp.float32)
            # Gate blocks were reordered to [i, f, o, g] at weight-prep time:
            # one sigmoid slab + one tanh slab, all lane-aligned (Hp % 128 == 0).
            sig = jax.nn.sigmoid(gates[:, 0:3 * Hp])
            g_g = jnp.tanh(gates[:, 3 * Hp:4 * Hp])
            i_g = sig[:, 0:Hp]
            f_g = sig[:, Hp:2 * Hp]
            o_g = sig[:, 2 * Hp:3 * Hp]
            c_new = f_g * c_prev + i_g * g_g
            h_new = o_g * jnp.tanh(c_new)
            hseq_sc[t] = h_new            # padded-time rows are sliced off outside
            if mask_tail:
                # Keep h/c frozen past the real sequence end so hN/cN are exact.
                m = (base + t < L_real).astype(jnp.float32)
                h_new = h_prev + m * (h_new - h_prev)
                c_new = c_prev + m * (c_new - c_prev)
            h_sc[...] = h_new
            c_sc[...] = c_new
            return carry

        jax.lax.fori_loop(0, Tc, step, 0, unroll=min(4, Tc))

        # Fused vocab projection for this chunk (hseq never touches HBM).
        hs = hseq_sc[...].reshape(Tc * Bp, Hp)
        sc = jnp.dot(hs, wproj_ref[...],
                     preferred_element_type=jnp.float32) + bproj_ref[...]
        scores_ref[...] = sc.reshape(Tc, Bp, Vp)
        hN_ref[...] = h_sc[...]
        cN_ref[...] = c_sc[...]

    return kernel


def char_decoder_forward(input_ids, params, dec_hidden=None, *, time_chunk=32):
    """Equivalent of CharDecoder.forward.

    input_ids : (L, B) int32
    params    : dict with 'emb' (V,E), 'W_ih' (4H,E), 'W_hh' (4H,H),
                'b_ih' (4H,), 'b_hh' (4H,), 'W_proj' (V,H), 'b_proj' (V,)
    dec_hidden: optional tuple of (1,B,H) arrays
    returns   : scores (L,B,V), (h_n (1,B,H), c_n (1,B,H))
    """
    L, B = input_ids.shape
    V, E = params["emb"].shape
    H = params["W_hh"].shape[1]
    f32 = jnp.float32

    Bp = _round_up(B, 8)       # f32 sublanes
    Hp = _round_up(H, 128)     # lane-aligned gate blocks
    Vp = _round_up(V, 128)     # lane-dense score stores
    Tc = min(time_chunk, L)    # time-chunk length
    L_pad = _round_up(L, Tc)
    n_chunks = L_pad // Tc
    mask_tail = (L_pad != L)

    # ---- weight prep: reorder PyTorch [i,f,g,o] gate blocks to [i,f,o,g], pad per block ----
    perm = jnp.array([0, 1, 3, 2])

    def prep_gates(w, pad_in=0):
        K = w.shape[1]
        w4 = w.reshape(4, H, K)[perm]
        w4 = jnp.pad(w4, ((0, 0), (0, Hp - H), (0, pad_in)))
        return w4.reshape(4 * Hp, K + pad_in)

    wih_t = prep_gates(params["W_ih"]).T.astype(f32)                    # (E, 4Hp)
    whh_t = prep_gates(params["W_hh"], pad_in=Hp - H).T.astype(f32)     # (Hp, 4Hp)
    bias = (params["b_ih"] + params["b_hh"]).reshape(4, H)[perm]
    bias = jnp.pad(bias, ((0, 0), (0, Hp - H))).reshape(4 * Hp).astype(f32)
    wproj_t = jnp.pad(params["W_proj"],
                      ((0, Vp - V), (0, Hp - H))).T.astype(f32)         # (Hp, Vp)
    bproj = jnp.pad(params["b_proj"], (0, Vp - V)).astype(f32).reshape(1, Vp)

    # ---- (1) fold embedding into W_ih: tiny gate table G (V, 4Hp) via Pallas dense ----
    G = _dense(params["emb"].astype(f32), wih_t, bias)                  # (V, 4Hp)

    # Per-token input-gate contribution = row gather (XLA glue), zero-padded batch/time.
    # Padded batch rows get zero xg and zero initial state -> remain exactly zero.
    xg = jnp.take(G, input_ids, axis=0)                                 # (L, B, 4Hp)
    xg = jnp.pad(xg, ((0, L_pad - L), (0, Bp - B), (0, 0)))             # (L_pad, Bp, 4Hp)

    if dec_hidden is None:
        h0 = jnp.zeros((B, H), f32)
        c0 = jnp.zeros((B, H), f32)
    else:
        h0 = dec_hidden[0][0].astype(f32)
        c0 = dec_hidden[1][0].astype(f32)
    h0_p = jnp.pad(h0, ((0, Bp - B), (0, Hp - H)))                      # (Bp, Hp)
    c0_p = jnp.pad(c0, ((0, Bp - B), (0, Hp - H)))                      # (Bp, Hp)

    # ---- (2) time-chunked recurrence + fused projection ----
    kernel = _make_lstm_kernel(L, Tc, Hp, Vp, mask_tail)
    scores, h_n, c_n = pl.pallas_call(
        kernel,
        out_shape=(
            jax.ShapeDtypeStruct((L_pad, Bp, Vp), f32),
            jax.ShapeDtypeStruct((Bp, Hp), f32),
            jax.ShapeDtypeStruct((Bp, Hp), f32),
        ),
        grid_spec=pltpu.PrefetchScalarGridSpec(
            num_scalar_prefetch=0,
            grid=(n_chunks,),
            in_specs=[
                pl.BlockSpec((Tc, Bp, 4 * Hp), lambda i: (i, 0, 0)),    # xg chunk
                pl.BlockSpec((Hp, 4 * Hp), lambda i: (0, 0)),           # W_hh^T (resident)
                pl.BlockSpec((Hp, Vp), lambda i: (0, 0)),               # W_proj^T (resident)
                pl.BlockSpec((1, Vp), lambda i: (0, 0)),                # b_proj
                pl.BlockSpec((Bp, Hp), lambda i: (0, 0)),               # h0
                pl.BlockSpec((Bp, Hp), lambda i: (0, 0)),               # c0
            ],
            out_specs=[
                pl.BlockSpec((Tc, Bp, Vp), lambda i: (i, 0, 0)),        # scores chunk
                pl.BlockSpec((Bp, Hp), lambda i: (0, 0)),               # h_n
                pl.BlockSpec((Bp, Hp), lambda i: (0, 0)),               # c_n
            ],
            scratch_shapes=[
                pltpu.VMEM((Bp, Hp), f32),        # h carry
                pltpu.VMEM((Bp, Hp), f32),        # c carry
                pltpu.VMEM((Tc, Bp, Hp), f32),    # per-chunk hidden sequence
            ],
        ),
        compiler_params=pltpu.CompilerParams(
            dimension_semantics=("arbitrary",)),  # chunks are serially dependent
    )(xg, whh_t, wproj_t, bproj, h0_p, c0_p)

    scores = scores[:L, :B, :V]
    return scores, (h_n[:B, :H][None], c_n[:B, :H][None])


def _reference_forward(input_ids, params, dec_hidden=None):
    """Pure-JAX reference matching PyTorch nn.LSTM + Linear semantics."""
    L, B = input_ids.shape
    H = params["W_hh"].shape[1]
    embed = jnp.take(params["emb"], input_ids, axis=0)
    if dec_hidden is None:
        h = jnp.zeros((B, H), jnp.float32)
        c = jnp.zeros((B, H), jnp.float32)
    else:
        h, c = dec_hidden[0][0], dec_hidden[1][0]

    def step(carry, x):
        h, c = carry
        gates = x @ params["W_ih"].T + params["b_ih"] + h @ params["W_hh"].T + params["b_hh"]
        i = jax.nn.sigmoid(gates[:, 0 * H:1 * H])
        f = jax.nn.sigmoid(gates[:, 1 * H:2 * H])
        g = jnp.tanh(gates[:, 2 * H:3 * H])
        o = jax.nn.sigmoid(gates[:, 3 * H:4 * H])
        c_new = f * c + i * g
        h_new = o * jnp.tanh(c_new)
        return (h_new, c_new), h_new @ params["W_proj"].T + params["b_proj"]

    (h, c), scores = jax.lax.scan(step, (h, c), embed)
    return scores, (h[None], c[None])


if __name__ == "__main__":
    # Small synthetic config consistent with CharDecoder.__init__
    L, B = 8, 4                 # (length, batch)
    hidden_size = 32
    char_embedding_size = 50
    vocab_size = 30             # len(target_vocab.char2id)
    pad_idx = 0                 # target_vocab.char2id['<pad>']

    key = jax.random.PRNGKey(0)
    ks = jax.random.split(key, 10)
    scale = 0.1
    emb = scale * jax.random.normal(ks[0], (vocab_size, char_embedding_size), jnp.float32)
    emb = emb.at[pad_idx].set(0.0)   # padding_idx row zeroed like nn.Embedding
    params = {
        "emb": emb,
        "W_ih": scale * jax.random.normal(ks[1], (4 * hidden_size, char_embedding_size), jnp.float32),
        "W_hh": scale * jax.random.normal(ks[2], (4 * hidden_size, hidden_size), jnp.float32),
        "b_ih": scale * jax.random.normal(ks[3], (4 * hidden_size,), jnp.float32),
        "b_hh": scale * jax.random.normal(ks[4], (4 * hidden_size,), jnp.float32),
        "W_proj": scale * jax.random.normal(ks[5], (vocab_size, hidden_size), jnp.float32),
        "b_proj": scale * jax.random.normal(ks[6], (vocab_size,), jnp.float32),
    }

    input_ids = jax.random.randint(ks[7], (L, B), 0, vocab_size, jnp.int32)
    h0 = scale * jax.random.normal(ks[8], (1, B, hidden_size), jnp.float32)
    c0 = jnp.zeros((1, B, hidden_size), jnp.float32)

    # --- test 1: provided dec_hidden, single time chunk ---
    scores, (h_n, c_n) = char_decoder_forward(input_ids, params, (h0, c0))
    jax.block_until_ready((scores, h_n, c_n))
    ref_scores, (ref_h, ref_c) = _reference_forward(input_ids, params, (h0, c0))
    assert scores.shape == (L, B, vocab_size)
    assert h_n.shape == (1, B, hidden_size) and c_n.shape == (1, B, hidden_size)
    assert jnp.allclose(scores, ref_scores, atol=1e-4, rtol=1e-4)
    assert jnp.allclose(h_n, ref_h, atol=1e-4, rtol=1e-4)
    assert jnp.allclose(c_n, ref_c, atol=1e-4, rtol=1e-4)

    # --- test 2: dec_hidden=None (zero initial state) path ---
    scores0, (h_n0, c_n0) = char_decoder_forward(input_ids, params, None)
    jax.block_until_ready((scores0, h_n0, c_n0))
    ref_scores0, (ref_h0, ref_c0) = _reference_forward(input_ids, params, None)
    assert jnp.allclose(scores0, ref_scores0, atol=1e-4, rtol=1e-4)
    assert jnp.allclose(h_n0, ref_h0, atol=1e-4, rtol=1e-4)
    assert jnp.allclose(c_n0, ref_c0, atol=1e-4, rtol=1e-4)

    # --- test 3: length not a multiple of the time chunk -> multi-chunk + masked tail ---
    L2 = 11
    input_ids2 = jax.random.randint(ks[9], (L2, B), 0, vocab_size, jnp.int32)
    scores2, (h_n2, c_n2) = char_decoder_forward(input_ids2, params, (h0, c0), time_chunk=4)
    jax.block_until_ready((scores2, h_n2, c_n2))
    ref_scores2, (ref_h2, ref_c2) = _reference_forward(input_ids2, params, (h0, c0))
    assert scores2.shape == (L2, B, vocab_size)
    assert jnp.allclose(scores2, ref_scores2, atol=1e-4, rtol=1e-4)
    assert jnp.allclose(h_n2, ref_h2, atol=1e-4, rtol=1e-4)
    assert jnp.allclose(c_n2, ref_c2, atol=1e-4, rtol=1e-4)

    # TODO(synk): train_forward (masked CE loss) and decode_greedy (python string loop)
    # are host-side orchestration around forward(); not implemented as kernels.
    print("KERNEL_OK")
</pallas_src>

<mosaic_0001>
module attributes {stable_mosaic.version = 11 : i64} {
  func.func @_dense_kernel(%arg0: i32, %arg1: memref<32x50xf32, #tpu.memory_space<vmem>>, %arg2: memref<50x512xf32, #tpu.memory_space<vmem>>, %arg3: memref<1x512xf32, #tpu.memory_space<vmem>>, %arg4: memref<32x512xf32, #tpu.memory_space<vmem>>) attributes {dimension_semantics = [#tpu.dimension_semantics<parallel>], iteration_bounds = array<i64: 1>, scalar_prefetch = 0 : i64, scratch_operands = 0 : i64, tpu.core_type = #tpu.core_type<tc>, window_params = [{transform_indices = @transform_0, window_bounds = array<i64: 32, 50>}, {pipeline_mode = #tpu.pipeline_mode<synchronous>, transform_indices = @transform_1, window_bounds = array<i64: 50, 512>}, {pipeline_mode = #tpu.pipeline_mode<synchronous>, transform_indices = @transform_2, window_bounds = array<i64: 1, 512>}, {transform_indices = @transform_3, window_bounds = array<i64: 32, 512>}]} {
    %c0 = arith.constant 0 : index
    %c0_0 = arith.constant 0 : index
    %0 = vector.load %arg1[%c0, %c0_0] : memref<32x50xf32, #tpu.memory_space<vmem>>, vector<32x50xf32>
    %c0_1 = arith.constant 0 : index
    %c0_2 = arith.constant 0 : index
    %1 = vector.load %arg2[%c0_1, %c0_2] : memref<50x512xf32, #tpu.memory_space<vmem>>, vector<50x512xf32>
    %cst = arith.constant dense<0.000000e+00> : vector<32x512xf32>
    %2 = tpu.matmul %0, %1, %cst {dimension_numbers = #tpu.dot_dimension_numbers<[1], [0], [0], [1], [0, 0, 1, 1], [], []>} : vector<32x50xf32>, vector<50x512xf32>, vector<32x512xf32> -> vector<32x512xf32>
    %c0_3 = arith.constant 0 : index
    %c0_4 = arith.constant 0 : index
    %3 = vector.load %arg3[%c0_3, %c0_4] : memref<1x512xf32, #tpu.memory_space<vmem>>, vector<1x512xf32>
    %4 = vector.broadcast %3 : vector<1x512xf32> to vector<32x512xf32>
    %5 = arith.addf %2, %4 : vector<32x512xf32>
    %c0_5 = arith.constant 0 : index
    %c0_6 = arith.constant 0 : index
    %6 = vector.load %arg4[%c0_5, %c0_6] : memref<32x512xf32, #tpu.memory_space<vmem>>, vector<32x512xf32>
    tpu.vector_store %arg4[%c0_5, %c0_6], %5 {strides = array<i32>} : memref<32x512xf32, #tpu.memory_space<vmem>>, vector<32x512xf32>,
    return
  }
  func.func @transform_0(%arg0: i32) -> (i32, i32) {
    %c0_i32 = arith.constant 0 : i32
    %c0_i32_0 = arith.constant 0 : i32
    return %arg0, %c0_i32 : i32, i32
  }
  func.func @transform_1(%arg0: i32) -> (i32, i32) {
    %c0_i32 = arith.constant 0 : i32
    %c0_i32_0 = arith.constant 0 : i32
    %c0_i32_1 = arith.constant 0 : i32
    return %c0_i32, %c0_i32_0 : i32, i32
  }
  func.func @transform_2(%arg0: i32) -> (i32, i32) {
    %c0_i32 = arith.constant 0 : i32
    %c0_i32_0 = arith.constant 0 : i32
    %c0_i32_1 = arith.constant 0 : i32
    return %c0_i32, %c0_i32_0 : i32, i32
  }
  func.func @transform_3(%arg0: i32) -> (i32, i32) {
    %c0_i32 = arith.constant 0 : i32
    %c0_i32_0 = arith.constant 0 : i32
    return %arg0, %c0_i32 : i32, i32
  }
}

</mosaic_0001>

<bundles_post_ra>
// kernel: tpu_custom_call.1
= control target key start
LH: loop header
LB: loop body
LE: loop exit
PB: predicated region body
PF: predicated region fallthrough
CT: control target
= control target key end

     0   :  { %8 = vsyncpa [#allocation3], 0  ;;  %s516_s0 = inlined_call_operand.hbm [shape: f32[32,50], index: 0, kind: input, shape index: {}]   ;;  %s517_s1 = inlined_call_operand.hbm [shape: f32[50,512], index: 1, kind: input, shape index: {}]   ;;  %s518_s2 = inlined_call_operand.hbm [shape: f32[1,512], index: 2, kind: input, shape index: {}]   ;;  %s519_s3 = inlined_call_operand.hbm [shape: f32[32,512], index: 3, kind: output, shape index: {}]  }
   0x1   :  { %9 = vsyncpa [#allocation6], 0 }
   0x2   :  { %10 = vsyncpa [#allocation4], 0  ;;  %s453_s12 = smov [#allocation5]  }
   0x3   :  { %s28_s13 = sshll.u32 %s453_s12, 4  ;;  %s29_s13 = int_to_ptr.vmem [resolvable:$true] %s28_s13 }
   0x4   :  { %s375_s14 = scalar_lea.vmem %s29_s13, 3584  ;;  %p380_p1 = scmp.lt.s32.totalorder %s29_s13, %s29_s13 }
   0x5   :  { %p376_p0 = scmp.ne.s32.totalorder %s29_s13, %s375_s14  ;;  %p381_p2 = scmp.lt.s32.totalorder %s375_s14, %s375_s14 }
   0x7   :  { %p382_p3 = por %p381_p2, %p380_p1 }
   0x9   :  { %p383_p4 = pnand %p382_p3, %p376_p0 }
   0xb   :  { %386 = shalt.err (!%p383_p4)
}
   0xc   :  { %s454_s15 = smov 512   ;;  %s455_s16 = smov 32  }
   0xd   :  { %34 = dma.hbm_to_vmem [thread:$0]  %s517_s1, 3584, %s29_s13, [#allocation6], %s454_s15, %s454_s15, %s455_s16  }
   0xe   :  { %s456_s19 = smov [#allocation2]  }
   0xf   :  { %s16_s20 = sshll.u32 %s456_s19, 4  ;;  %s17_s20 = int_to_ptr.vmem [resolvable:$true] %s16_s20 }
  0x10   :  { %s395_s21 = scalar_lea.vmem %s17_s20, 512  ;;  %p400_p6 = scmp.lt.s32.totalorder %s17_s20, %s17_s20 }
  0x11   :  { %p396_p5 = scmp.ne.s32.totalorder %s17_s20, %s395_s21  ;;  %p401_p7 = scmp.lt.s32.totalorder %s395_s21, %s395_s21 }
  0x13   :  { %p402_p8 = por %p401_p7, %p400_p6 }
  0x15   :  { %p403_p9 = pnand %p402_p8, %p396_p5 }
  0x17   :  { %406 = shalt.err (!%p403_p9)
}
  0x18   :  { %s457_s22 = smov 128   ;;  %s458_s23 = smov 8  }
  0x19   :  { %22 = dma.hbm_to_vmem [thread:$0]  %s516_s0, 512, %s17_s20, [#allocation3], %s457_s22, %s457_s22, %s458_s23  }
  0x1a   :  { %s459_s26 = smov [#allocation7]  }
  0x1b   :  { %s41_s27 = sshll.u32 %s459_s26, 4  ;;  %s42_s27 = int_to_ptr.vmem [resolvable:$true] %s41_s27 }
  0x1c   :  { %s415_s1 = scalar_lea.vmem %s42_s27, 64  ;;  %p420_p11 = scmp.lt.s32.totalorder %s42_s27, %s42_s27 }
  0x1d   :  { %p416_p10 = scmp.ne.s32.totalorder %s42_s27, %s415_s1  ;;  %p421_p12 = scmp.lt.s32.totalorder %s415_s1, %s415_s1 }
  0x1f   :  { %p422_p13 = por %p421_p12, %p420_p11 }
  0x21   :  { %p423_p0 = pnand %p422_p13, %p416_p10 }
  0x23   :  { %426 = shalt.err (!%p423_p0)
}
  0x24   :  { %44 = dma.hbm_to_vmem [thread:$0]  %s518_s2, 64, %s42_s27, [#allocation6]  }
  0x25   :  { %447 = dma.done.wait [#allocation3], 512  }
  0x26   :  { %448 = vsyncadd [#allocation3], 4294966784 }
  0x27   :  { %449 = dma.done.wait [#allocation6], 3648  }
  0x28   :  { %450 = vsyncadd [#allocation6], 4294963648  ;;  %v460_v0 = vmov 0.0   ;;  %vm121_vm0 = vcmask 1041408   ;;  %v83_v1 = vld [vmem:[#allocation5 + $0xc8] sm:$0x3]  ;;  %v88_v33 = vlaneseq }
  0x29   :  { %198 = vmatprep.mubr.f32.mxu0 %v460_v0  ;;  %287 = vmatprep.mubr.f32.mxu1 %v460_v0  ;;  %v85_v2 = vld [vmem:[#allocation5 + $0xd8] sm:$0x3]  ;;  %v82_v3 = vld [vmem:[#allocation5 + $0xc0] sm:$0x3]  ;;  %v84_v4 = vld [vmem:[#allocation5 + $0xd0] sm:$0x3] }
  0x2a   :  { %346 = vmatprep.subr.msk.mxu0 %vm121_vm0, %v83_v1  ;;  %352 = vmatprep.subr.msk.mxu1 %vm121_vm0, %v85_v2  ;;  %v79_v5 = vld [vmem:[#allocation5 + $0xa8] sm:$0xff]  ;;  %v81_v6 = vld [vmem:[#allocation5 + $0xb8] sm:$0xff]  ;;  %v78_v7 = vld [vmem:[#allocation5 + $0xa0] sm:$0xff]  ;;  %vm108_vm1 = vcmask 408576   ;;  %v89_v34 = vshrl.u32 %v88_v33, 7  ;;  %s461_s0 = smov [#allocation8]  }
  0x2b   :  { %347 = vmatpush1.msk.msra.mxu0 %vm121_vm0, %v82_v3  ;;  %353 = vmatpush1.msk.msra.mxu1 %vm121_vm0, %v84_v4  ;;  %v80_v8 = vld [vmem:[#allocation5 + $0xb0] sm:$0xff]  ;;  %v75_v9 = vld [vmem:[#allocation5 + $0x88] sm:$0xff]  ;;  %v77_v10 = vld [vmem:[#allocation5 + $0x98] sm:$0xff]  ;;  %s333_s2 = sshll.u32 %s461_s0, 4  ;;  %s334_s2 = int_to_ptr.vmem [resolvable:$true] %s333_s2 }
  0x2c   :  { %154 = vmatprep.subr.mxu0 %v79_v5  ;;  %243 = vmatprep.subr.mxu1 %v81_v6  ;;  %v74_v11 = vld [vmem:[#allocation5 + $0x80] sm:$0xff]  ;;  %v76_v12 = vld [vmem:[#allocation5 + $0x90] sm:$0xff]  ;;  %v71_v13 = vld [vmem:[#allocation5 + $0x68] sm:$0xff]  ;;  %v90_v35 = vsub.s32 0, %v89_v34  ;;  %v98_v36 = vsub.s32 2, %v89_v34  ;;  %v94_v38 = vsub.s32 1, %v89_v34  ;;  %p432_p2 = scmp.lt.s32.totalorder %s334_s2, %s334_s2 }
  0x2d   :  { %155 = vmatpush1.msra.mxu0 %v78_v7  ;;  %244 = vmatpush1.msra.mxu1 %v80_v8  ;;  %v73_v14 = vld [vmem:[#allocation5 + $0x78] sm:$0xff]  ;;  %v70_v15 = vld [vmem:[#allocation5 + $0x60] sm:$0xff]  ;;  %v72_v16 = vld [vmem:[#allocation5 + $0x70] sm:$0xff]  ;;  %v102_v39 = vsub.s32 3, %v89_v34  ;;  %s427_s30 = scalar_lea.vmem %s334_s2, 2048 }
  0x2e   :  { %156 = vmatprep.subr.mxu0 %v75_v9  ;;  %245 = vmatprep.subr.mxu1 %v77_v10  ;;  %v67_v17 = vld [vmem:[#allocation5 + $0x48] sm:$0xff]  ;;  %v69_v18 = vld [vmem:[#allocation5 + $0x58] sm:$0xff]  ;;  %v66_v19 = vld [vmem:[#allocation5 + $0x40] sm:$0xff]  ;;  %p428_p1 = scmp.ne.s32.totalorder %s334_s2, %s427_s30  ;;  %p433_p3 = scmp.lt.s32.totalorder %s427_s30, %s427_s30 }
  0x2f   :  { %157 = vmatpush1.msra.mxu0 %v74_v11  ;;  %246 = vmatpush1.msra.mxu1 %v76_v12  ;;  %v68_v20 = vld [vmem:[#allocation5 + $0x50] sm:$0xff]  ;;  %v63_v21 = vld [vmem:[#allocation5 + $0x28] sm:$0xff]  ;;  %v65_v22 = vld [vmem:[#allocation5 + $0x38] sm:$0xff] }
  0x30   :  { %158 = vmatprep.subr.mxu0 %v71_v13  ;;  %247 = vmatprep.subr.mxu1 %v73_v14  ;;  %v62_v23 = vld [vmem:[#allocation5 + $0x20] sm:$0xff]  ;;  %v64_v24 = vld [vmem:[#allocation5 + $0x30] sm:$0xff]  ;;  %v59_v25 = vld [vmem:[#allocation5 + $0x8] sm:$0xff]  ;;  %p434_p4 = por %p433_p3, %p432_p2 }
  0x31   :  { %159 = vmatpush1.msra.mxu0 %v70_v15  ;;  %248 = vmatpush1.msra.mxu1 %v72_v16  ;;  %v61_v26 = vld [vmem:[#allocation5 + $0x18] sm:$0xff]  ;;  %v58_v27 = vld [vmem:[#allocation5] sm:$0xff]  ;;  %v60_v28 = vld [vmem:[#allocation5 + $0x10] sm:$0xff] }
  0x32   :  { %160 = vmatprep.subr.mxu0 %v67_v17  ;;  %249 = vmatprep.subr.mxu1 %v69_v18  ;;  %v54_v29 = vld [vmem:[#allocation2] sm:$0xff]  ;;  %v55_v30 = vld [vmem:[#allocation2 + $0x8] sm:$0xff]  ;;  %v56_v31 = vld [vmem:[#allocation2 + $0x10] sm:$0xff]  ;;  %p435_p5 = pnand %p434_p4, %p428_p1 }
  0x33   :  { %161 = vmatpush1.msra.mxu0 %v66_v19  ;;  %250 = vmatpush1.msra.mxu1 %v68_v20  ;;  %v57_v32 = vld [vmem:[#allocation2 + $0x18] sm:$0xff]  ;;  %v86_v37 = vld [vmem:[#allocation7] sm:$0xf] }
  0x34   :  { %162 = vmatprep.subr.mxu0 %v63_v21  ;;  %251 = vmatprep.subr.mxu1 %v65_v22  ;;  %v91_v40 = vrot.slane %v86_v37, %v90_v35  ;;  %v99_v41 = vrot.slane %v86_v37, %v98_v36  ;;  %v95_v42 = vrot.slane %v86_v37, %v94_v38 }
  0x35   :  { %163 = vmatpush1.msra.mxu0 %v62_v23  ;;  %252 = vmatpush1.msra.mxu1 %v64_v24  ;;  %v103_v43 = vrot.slane %v86_v37, %v102_v39 }
  0x36   :  { %164 = vmatprep.subr.mxu0 %v59_v25  ;;  %253 = vmatprep.subr.mxu1 %v61_v26 }
  0x37   :  { %165 = vmatpush1.msra.mxu0 %v58_v27  ;;  %254 = vmatpush1.msra.mxu1 %v60_v28 }
  0x38   :  { %348 = vmatmul.mubr.msk.f32.vlgmr.msra.gmra.mxu0 %vm108_vm1, %v54_v29  ;;  %354 = vmatmul.mubr.msk.f32.vlgmr.msra.gmra.mxu1 %vm108_vm1, %v54_v29 }
  0x39   :  { %204 = vmatprep.mubr.f32.mxu0 %v460_v0  ;;  %293 = vmatprep.mubr.f32.mxu1 %v460_v0 }
  0x3c   :  { %349 = vmatmul.mubr.msk.f32.gmra.mxu0 %vm108_vm1, %v55_v30  ;;  %355 = vmatmul.mubr.msk.f32.gmra.mxu1 %vm108_vm1, %v55_v30 }
  0x3d   :  { %210 = vmatprep.mubr.f32.mxu0 %v460_v0  ;;  %299 = vmatprep.mubr.f32.mxu1 %v460_v0 }
  0x40   :  { %350 = vmatmul.mubr.msk.f32.gmra.mxu0 %vm108_vm1, %v56_v31  ;;  %356 = vmatmul.mubr.msk.f32.gmra.mxu1 %vm108_vm1, %v56_v31 }
  0x41   :  { %216 = vmatprep.mubr.f32.mxu0 %v460_v0  ;;  %305 = vmatprep.mubr.f32.mxu1 %v460_v0 }
  0x44   :  { %351 = vmatmul.mubr.msk.f32.gmra.mxu0 %vm108_vm1, %v57_v32  ;;  %357 = vmatmul.mubr.msk.f32.gmra.mxu1 %vm108_vm1, %v57_v32 }
  0xf8   :  { %v200_v44 = vpop.f32.mrf.mxu0  ;;  %v289_v45 = vpop.f32.mrf.mxu1 }
  0xf9   :  { %v201_v46 = vadd.f32 %v200_v44, %v91_v40  ;;  %v290_v47 = vadd.f32 %v289_v45, %v99_v41 }
  0xfa   :  { %v202_v48 = vpop.f32.mrf.mxu0  ;;  %v291_v49 = vpop.f32.mrf.mxu1 }
  0xfb   :  { %312 = vst [vmem:[#allocation8] sm:$0xff] %v201_v46  ;;  %314 = vst [vmem:[#allocation8 + $0x10] sm:$0xff] %v290_v47  ;;  %v203_v50 = vadd.f32 %v202_v48, %v95_v42  ;;  %v292_v51 = vadd.f32 %v291_v49, %v103_v43 }
  0xfc   :  { %v206_v52 = vpop.f32.mrf.mxu0  ;;  %v295_v53 = vpop.f32.mrf.mxu1 }
  0xfd   :  { %313 = vst [vmem:[#allocation8 + $0x8] sm:$0xff] %v203_v50  ;;  %315 = vst [vmem:[#allocation8 + $0x18] sm:$0xff] %v292_v51  ;;  %v207_v54 = vadd.f32 %v206_v52, %v91_v40  ;;  %v296_v55 = vadd.f32 %v295_v53, %v99_v41 }
  0xfe   :  { %v208_v56 = vpop.f32.mrf.mxu0  ;;  %v297_v57 = vpop.f32.mrf.mxu1 }
  0xff   :  { %316 = vst [vmem:[#allocation8 + $0x20] sm:$0xff] %v207_v54  ;;  %318 = vst [vmem:[#allocation8 + $0x30] sm:$0xff] %v296_v55  ;;  %v209_v58 = vadd.f32 %v208_v56, %v95_v42  ;;  %v298_v59 = vadd.f32 %v297_v57, %v103_v43 }
 0x100   :  { %v212_v60 = vpop.f32.mrf.mxu0  ;;  %v301_v61 = vpop.f32.mrf.mxu1 }
 0x101   :  { %317 = vst [vmem:[#allocation8 + $0x28] sm:$0xff] %v209_v58  ;;  %319 = vst [vmem:[#allocation8 + $0x38] sm:$0xff] %v298_v59  ;;  %v213_v62 = vadd.f32 %v212_v60, %v91_v40  ;;  %v302_v63 = vadd.f32 %v301_v61, %v99_v41 }
 0x102   :  { %v214_v0 = vpop.f32.mrf.mxu0  ;;  %v303_v1 = vpop.f32.mrf.mxu1 }
 0x103   :  { %320 = vst [vmem:[#allocation8 + $0x40] sm:$0xff] %v213_v62  ;;  %322 = vst [vmem:[#allocation8 + $0x50] sm:$0xff] %v302_v63  ;;  %v215_v2 = vadd.f32 %v214_v0, %v95_v42  ;;  %v304_v3 = vadd.f32 %v303_v1, %v103_v43 }
 0x104   :  { %v218_v4 = vpop.f32.mrf.mxu0  ;;  %v307_v5 = vpop.f32.mrf.mxu1 }
 0x105   :  { %321 = vst [vmem:[#allocation8 + $0x48] sm:$0xff] %v215_v2  ;;  %323 = vst [vmem:[#allocation8 + $0x58] sm:$0xff] %v304_v3  ;;  %v219_v6 = vadd.f32 %v218_v4, %v91_v40  ;;  %v308_v7 = vadd.f32 %v307_v5, %v99_v41 }
 0x106   :  { %v220_v8 = vpop.f32.mrf.mxu0  ;;  %v309_v9 = vpop.f32.mrf.mxu1 }
 0x107   :  { %324 = vst [vmem:[#allocation8 + $0x60] sm:$0xff] %v219_v6  ;;  %326 = vst [vmem:[#allocation8 + $0x70] sm:$0xff] %v308_v7  ;;  %v221_v10 = vadd.f32 %v220_v8, %v95_v42  ;;  %v310_v11 = vadd.f32 %v309_v9, %v103_v43 }
 0x109   :  { %325 = vst [vmem:[#allocation8 + $0x68] sm:$0xff] %v221_v10  ;;  %327 = vst [vmem:[#allocation8 + $0x78] sm:$0xff] %v310_v11 }
 0x10a   :  { %438 = shalt.err (!%p435_p5)
}
 0x10b   :  { %339 = dma.vmem_to_hbm [thread:$0]  %s334_s2, 2048, %s519_s3, [#allocation4], %s454_s15, %s454_s15, %s455_s16  }
 0x10c   :  { %451 = dma.done.wait [#allocation4], 2048  }
 0x10d   :  { %452 = vsyncadd [#allocation4], 4294965248 }
 0x10e   :  { %343 = vsyncpa [#allocation3], 1 }
 0x10f   :  { %344 = vsyncpa [#allocation6], 1 }
 0x110   :  { %345 = vsyncpa [#allocation4], 1 }

</bundles_post_ra>
